<compile_context>
chip_gen: v7x
topology: tpu7x:2x2x1
jax: 0.10.0
libtpu: 0.0.40
codegen_flags: <defaults>
</compile_context>

<pallas_src>
import jax
import jax.numpy as jnp
import numpy as np
from jax import lax
from jax.experimental import pallas as pl
from jax.experimental.pallas import tpu as pltpu


def masked_attention_kernel(x_ref, maskb_ref, wqkv_ref, wproj_ref, bproj_ref,
                            o_ref, acc_ref):
    """Grid = (B, H): one (batch element, attention head) per step.

    x_ref     : (1, N, C)    bf16  (h-invariant block -> fetched once per batch)
    maskb_ref : (1, 1, N)    f32   (mask * masked_softmax_bias, precomputed)
    wqkv_ref  : (1, C, 3*hd) bf16  per-head fused [Wq*scale | Wk | Wv]
    wproj_ref : (1, hd, C)   bf16  per-head slice of the output projection
    bproj_ref : (1, C)       f32
    o_ref     : (1, N, C)    output block (written once, at the last head)
    acc_ref   : (N, C)       f32 VMEM accumulator across the head axis
    """
    h = pl.program_id(1)
    hd = wqkv_ref.shape[2] // 3
    n = acc_ref.shape[0]
    c = acc_ref.shape[1]

    # Init accumulator with the (head-independent) projection bias at h == 0;
    # the epilogue then only needs a cast + store.
    @pl.when(h == 0)
    def _():
        acc_ref[...] = jnp.broadcast_to(bproj_ref[...], (n, c)).astype(jnp.float32)

    x = x_ref[0]                                              # (N, C) bf16

    # One fused QKV matmul per head on the MXU (f32 accumulation).
    qkv = jnp.dot(x, wqkv_ref[0], preferred_element_type=jnp.float32)  # (N, 3hd)
    q = qkv[:, :hd]                                           # scale folded into Wq
    k = qkv[:, hd:2 * hd]
    v = qkv[:, 2 * hd:]

    # Attention logits q @ k^T (contract over head_dim), bf16 operands / f32 acc.
    attn = lax.dot_general(q.astype(jnp.bfloat16), k.astype(jnp.bfloat16),
                           (((1,), (1,)), ((), ())),
                           preferred_element_type=jnp.float32)          # (N, N)
    attn = attn + maskb_ref[0]                                # (1, N) bcast over queries

    # Numerically-stable softmax; division -> EUP reciprocal (approx).
    attn = attn - jnp.max(attn, axis=-1, keepdims=True)
    p = jnp.exp(attn)
    p = p * pl.reciprocal(jnp.sum(p, axis=-1, keepdims=True), approx=True)

    # (attn @ v) and this head's slice of the output projection, accumulated.
    oh = jnp.dot(p.astype(jnp.bfloat16), v.astype(jnp.bfloat16),
                 preferred_element_type=jnp.float32)                    # (N, hd)
    acc_ref[...] += jnp.dot(oh.astype(jnp.bfloat16), wproj_ref[0],
                            preferred_element_type=jnp.float32)         # (N, C)

    # Single lane-dense (N, C) store after the last head.
    @pl.when(h == pl.num_programs(1) - 1)
    def _():
        o_ref[0] = acc_ref[...].astype(o_ref.dtype)


def masked_attention(x, mask, w_qkv, w_proj, b_proj, *, num_heads,
                     masked_softmax_bias=-1000.0):
    B, N, C = x.shape
    assert C % num_heads == 0, "dim must be divisible by num_heads"
    hd = C // num_heads
    scale = float(hd) ** -0.5
    out_dtype = x.dtype

    # ---- host-side layout prep (pure XLA, runs once under jit) -------------
    wq, wk, wv = jnp.split(w_qkv, 3, axis=1)            # each (C, C)
    wq = wq * scale                                     # fold softmax scale into Wq

    def per_head(w):                                    # (C, C) -> (H, C, hd)
        return w.reshape(C, num_heads, hd).transpose(1, 0, 2)

    wqkv_h = jnp.concatenate([per_head(wq), per_head(wk), per_head(wv)],
                             axis=-1).astype(jnp.bfloat16)            # (H, C, 3hd)
    wproj_h = w_proj.reshape(num_heads, hd, C).astype(jnp.bfloat16)   # (H, hd, C)
    bproj2 = b_proj.reshape(1, C).astype(jnp.float32)
    mask_bias = (mask.astype(jnp.float32) * masked_softmax_bias).reshape(B, 1, N)
    x_bf16 = x.astype(jnp.bfloat16)

    # ---- explicit VMEM budget (double-buffered blocks + temporaries) -------
    bf16, f32 = 2, 4
    vmem_est = (
        2 * N * C * bf16            # x block
        + 2 * N * f32               # mask-bias row
        + 2 * C * 3 * hd * bf16     # per-head fused QKV weights
        + 2 * hd * C * bf16         # per-head output-projection slice
        + 2 * C * f32               # projection bias
        + 2 * N * C * f32           # output block
        + N * C * f32               # f32 accumulator scratch
        + 4 * N * N * f32           # attn logits / exp / softmax temporaries
        + 4 * N * 3 * hd * f32      # q/k/v temporaries
    )
    vmem_limit = max(32 * 1024 * 1024, min(int(1.5 * vmem_est), 64 * 1024 * 1024))

    grid_spec = pltpu.PrefetchScalarGridSpec(
        num_scalar_prefetch=0,
        grid=(B, num_heads),
        in_specs=[
            pl.BlockSpec((1, N, C), lambda b, h: (b, 0, 0)),       # x (h-invariant)
            pl.BlockSpec((1, 1, N), lambda b, h: (b, 0, 0)),       # mask * bias
            pl.BlockSpec((1, C, 3 * hd), lambda b, h: (h, 0, 0)),  # per-head Wqkv
            pl.BlockSpec((1, hd, C), lambda b, h: (h, 0, 0)),      # per-head Wproj
            pl.BlockSpec((1, C), lambda b, h: (0, 0)),             # proj bias
        ],
        out_specs=pl.BlockSpec((1, N, C), lambda b, h: (b, 0, 0)),
        scratch_shapes=[pltpu.VMEM((N, C), jnp.float32)],
    )

    return pl.pallas_call(
        masked_attention_kernel,
        out_shape=jax.ShapeDtypeStruct((B, N, C), out_dtype),
        grid_spec=grid_spec,
        compiler_params=pltpu.CompilerParams(
            dimension_semantics=("parallel", "arbitrary"),
            vmem_limit_bytes=vmem_limit),
    )(x_bf16, mask_bias, wqkv_h, wproj_h, bproj2)


def masked_attention_ref(x, mask, w_qkv, w_proj, b_proj, *, num_heads,
                         masked_softmax_bias=-1000.0):
    """Pure-JAX (f32) reference mirroring the PyTorch forward."""
    B, N, C = x.shape
    hd = C // num_heads
    scale = float(hd) ** -0.5
    qkv = x @ w_qkv                                   # (B, N, 3C)
    qkv = qkv.reshape(B, N, 3, num_heads, hd).transpose(2, 0, 3, 1, 4)
    q, k, v = qkv[0], qkv[1], qkv[2]                  # (B, H, N, hd)
    attn = jnp.einsum('bhqd,bhkd->bhqk', q, k) * scale
    attn = attn + mask[:, None, None, :] * masked_softmax_bias
    attn = jax.nn.softmax(attn, axis=-1)
    out = jnp.einsum('bhqk,bhkd->bhqd', attn, v)      # (B, H, N, hd)
    out = out.transpose(0, 2, 1, 3).reshape(B, N, C)
    return out @ w_proj + b_proj


if __name__ == "__main__":
    B, N, C, H = 2, 8, 32, 4

    key = jax.random.PRNGKey(0)
    kx, kmask, kqkv, kproj, kbias = jax.random.split(key, 5)

    x = jax.random.normal(kx, (B, N, C), dtype=jnp.float32)
    # binary key mask (1.0 = masked-out token), mimicking the ViT token mask
    mask = (jax.random.uniform(kmask, (B, N)) > 0.7).astype(jnp.float32)

    # deterministic "trunc_normal_"-like init (std=0.02)
    w_qkv = 0.02 * jax.random.normal(kqkv, (C, 3 * C), dtype=jnp.float32)
    w_proj = 0.02 * jax.random.normal(kproj, (C, C), dtype=jnp.float32)
    b_proj = 0.02 * jax.random.normal(kbias, (C,), dtype=jnp.float32)

    out = masked_attention(x, mask, w_qkv, w_proj, b_proj, num_heads=H)
    out = jax.block_until_ready(out)

    ref = masked_attention_ref(x, mask, w_qkv, w_proj, b_proj, num_heads=H)
    # bf16 MXU operands + approx reciprocal -> relaxed tolerances vs f32 ref.
    np.testing.assert_allclose(np.asarray(out), np.asarray(ref),
                               rtol=2e-2, atol=5e-3)

    print("KERNEL_OK")
</pallas_src>

<mosaic_0001>
module attributes {stable_mosaic.version = 11 : i64} {
  func.func @masked_attention_kernel(%arg0: i32, %arg1: i32, %arg2: memref<1x8x32xbf16, #tpu.memory_space<vmem>>, %arg3: memref<1x1x8xf32, #tpu.memory_space<vmem>>, %arg4: memref<1x32x24xbf16, #tpu.memory_space<vmem>>, %arg5: memref<1x8x32xbf16, #tpu.memory_space<vmem>>, %arg6: memref<1x32xf32, #tpu.memory_space<vmem>>, %arg7: memref<1x8x32xf32, #tpu.memory_space<vmem>>, %arg8: memref<8x32xf32, #tpu.memory_space<vmem>>) attributes {dimension_semantics = [#tpu.dimension_semantics<parallel>, #tpu.dimension_semantics<arbitrary>], iteration_bounds = array<i64: 2, 4>, scalar_prefetch = 0 : i64, scratch_operands = 1 : i64, tpu.core_type = #tpu.core_type<tc>, window_params = [{transform_indices = @transform_0, window_bounds = array<i64: 1, 8, 32>}, {transform_indices = @transform_1, window_bounds = array<i64: 1, 1, 8>}, {transform_indices = @transform_2, window_bounds = array<i64: 1, 32, 24>}, {transform_indices = @transform_3, window_bounds = array<i64: 1, 8, 32>}, {pipeline_mode = #tpu.pipeline_mode<synchronous>, transform_indices = @transform_4, window_bounds = array<i64: 1, 32>}, {transform_indices = @transform_5, window_bounds = array<i64: 1, 8, 32>}]} {
    %c0_i32 = arith.constant 0 : i32
    %0 = arith.cmpi eq, %arg1, %c0_i32 : i32
    %1 = arith.extui %0 : i1 to i32
    %c0_i32_0 = arith.constant 0 : i32
    %2 = arith.cmpi ne, %1, %c0_i32_0 : i32
    scf.if %2 {
      %c0_22 = arith.constant 0 : index
      %c0_23 = arith.constant 0 : index
      %41 = vector.load %arg6[%c0_22, %c0_23] : memref<1x32xf32, #tpu.memory_space<vmem>>, vector<1x32xf32>
      %42 = vector.shape_cast %41 : vector<1x32xf32> to vector<1x32xf32>
      %43 = vector.broadcast %42 : vector<1x32xf32> to vector<8x32xf32>
      %c0_24 = arith.constant 0 : index
      %c0_25 = arith.constant 0 : index
      %44 = vector.load %arg8[%c0_24, %c0_25] : memref<8x32xf32, #tpu.memory_space<vmem>>, vector<8x32xf32>
      tpu.vector_store %arg8[%c0_24, %c0_25], %43 {strides = array<i32>} : memref<8x32xf32, #tpu.memory_space<vmem>>, vector<8x32xf32>,
    } else {
    }
    %c0 = arith.constant 0 : index
    %c0_1 = arith.constant 0 : index
    %c0_2 = arith.constant 0 : index
    %3 = vector.load %arg2[%c0, %c0_1, %c0_2] : memref<1x8x32xbf16, #tpu.memory_space<vmem>>, vector<1x8x32xbf16>
    %4 = vector.shape_cast %3 : vector<1x8x32xbf16> to vector<8x32xbf16>
    %c0_3 = arith.constant 0 : index
    %c0_4 = arith.constant 0 : index
    %c0_5 = arith.constant 0 : index
    %5 = vector.load %arg4[%c0_3, %c0_4, %c0_5] : memref<1x32x24xbf16, #tpu.memory_space<vmem>>, vector<1x32x24xbf16>
    %6 = vector.shape_cast %5 : vector<1x32x24xbf16> to vector<32x24xbf16>
    %cst = arith.constant dense<0.000000e+00> : vector<8x24xf32>
    %7 = tpu.matmul %4, %6, %cst {dimension_numbers = #tpu.dot_dimension_numbers<[1], [0], [0], [1], [0, 0, 1, 1], [], []>} : vector<8x32xbf16>, vector<32x24xbf16>, vector<8x24xf32> -> vector<8x24xf32>
    %8 = vector.extract_strided_slice %7 {offsets = [0, 0], sizes = [8, 8], strides = [1, 1]} : vector<8x24xf32> to vector<8x8xf32>
    %9 = vector.extract_strided_slice %7 {offsets = [0, 8], sizes = [8, 8], strides = [1, 1]} : vector<8x24xf32> to vector<8x8xf32>
    %10 = vector.extract_strided_slice %7 {offsets = [0, 16], sizes = [8, 8], strides = [1, 1]} : vector<8x24xf32> to vector<8x8xf32>
    %11 = arith.truncf %8 : vector<8x8xf32> to vector<8x8xbf16>
    %12 = arith.truncf %9 : vector<8x8xf32> to vector<8x8xbf16>
    %cst_6 = arith.constant dense<0.000000e+00> : vector<8x8xf32>
    %13 = tpu.matmul %11, %12, %cst_6 {dimension_numbers = #tpu.dot_dimension_numbers<[1], [1], [0], [0], [0, 0, 1, 0], [], []>} : vector<8x8xbf16>, vector<8x8xbf16>, vector<8x8xf32> -> vector<8x8xf32>
    %c0_7 = arith.constant 0 : index
    %c0_8 = arith.constant 0 : index
    %c0_9 = arith.constant 0 : index
    %14 = vector.load %arg3[%c0_7, %c0_8, %c0_9] : memref<1x1x8xf32, #tpu.memory_space<vmem>>, vector<1x1x8xf32>
    %15 = vector.shape_cast %14 : vector<1x1x8xf32> to vector<1x8xf32>
    %16 = vector.broadcast %15 : vector<1x8xf32> to vector<8x8xf32>
    %17 = arith.addf %13, %16 : vector<8x8xf32>
    %cst_10 = arith.constant dense<0xFF800000> : vector<8xf32>
    %18 = vector.multi_reduction <maximumf>, %17, %cst_10 [1] : vector<8x8xf32> to vector<8xf32>
    %19 = vector.shape_cast %18 : vector<8xf32> to vector<8x1xf32>
    %20 = vector.broadcast %19 : vector<8x1xf32> to vector<8x8xf32>
    %21 = arith.subf %17, %20 : vector<8x8xf32>
    %22 = math.exp %21 : vector<8x8xf32>
    %cst_11 = arith.constant dense<0.000000e+00> : vector<8xf32>
    %23 = vector.multi_reduction <add>, %22, %cst_11 [1] : vector<8x8xf32> to vector<8xf32>
    %24 = vector.shape_cast %23 : vector<8xf32> to vector<8x1xf32>
    %25 = tpu.reciprocal %24 {approx = true} : vector<8x1xf32> -> vector<8x1xf32>
    %26 = vector.broadcast %25 : vector<8x1xf32> to vector<8x8xf32>
    %27 = arith.mulf %22, %26 : vector<8x8xf32>
    %28 = arith.truncf %27 : vector<8x8xf32> to vector<8x8xbf16>
    %29 = arith.truncf %10 : vector<8x8xf32> to vector<8x8xbf16>
    %cst_12 = arith.constant dense<0.000000e+00> : vector<8x8xf32>
    %30 = tpu.matmul %28, %29, %cst_12 {dimension_numbers = #tpu.dot_dimension_numbers<[1], [0], [0], [1], [0, 0, 1, 1], [], []>} : vector<8x8xbf16>, vector<8x8xbf16>, vector<8x8xf32> -> vector<8x8xf32>
    %c0_13 = arith.constant 0 : index
    %c0_14 = arith.constant 0 : index
    %31 = vector.load %arg8[%c0_13, %c0_14] : memref<8x32xf32, #tpu.memory_space<vmem>>, vector<8x32xf32>
    %32 = arith.truncf %30 : vector<8x8xf32> to vector<8x8xbf16>
    %c0_15 = arith.constant 0 : index
    %c0_16 = arith.constant 0 : index
    %c0_17 = arith.constant 0 : index
    %33 = vector.load %arg5[%c0_15, %c0_16, %c0_17] : memref<1x8x32xbf16, #tpu.memory_space<vmem>>, vector<1x8x32xbf16>
    %34 = vector.shape_cast %33 : vector<1x8x32xbf16> to vector<8x32xbf16>
    %cst_18 = arith.constant dense<0.000000e+00> : vector<8x32xf32>
    %35 = tpu.matmul %32, %34, %cst_18 {dimension_numbers = #tpu.dot_dimension_numbers<[1], [0], [0], [1], [0, 0, 1, 1], [], []>} : vector<8x8xbf16>, vector<8x32xbf16>, vector<8x32xf32> -> vector<8x32xf32>
    %36 = arith.addf %31, %35 : vector<8x32xf32>
    %c0_19 = arith.constant 0 : index
    %c0_20 = arith.constant 0 : index
    %37 = vector.load %arg8[%c0_19, %c0_20] : memref<8x32xf32, #tpu.memory_space<vmem>>, vector<8x32xf32>
    tpu.vector_store %arg8[%c0_19, %c0_20], %36 {strides = array<i32>} : memref<8x32xf32, #tpu.memory_space<vmem>>, vector<8x32xf32>,
    %c3_i32 = arith.constant 3 : i32
    %38 = arith.cmpi eq, %arg1, %c3_i32 : i32
    %39 = arith.extui %38 : i1 to i32
    %c0_i32_21 = arith.constant 0 : i32
    %40 = arith.cmpi ne, %39, %c0_i32_21 : i32
    scf.if %40 {
      %c0_22 = arith.constant 0 : index
      %c0_23 = arith.constant 0 : index
      %41 = vector.load %arg8[%c0_22, %c0_23] : memref<8x32xf32, #tpu.memory_space<vmem>>, vector<8x32xf32>
      %c0_24 = arith.constant 0 : index
      %c0_25 = arith.constant 0 : index
      %c0_26 = arith.constant 0 : index
      %42 = vector.load %arg7[%c0_24, %c0_25, %c0_26] : memref<1x8x32xf32, #tpu.memory_space<vmem>>, vector<1x8x32xf32>
      %43 = vector.shape_cast %42 : vector<1x8x32xf32> to vector<8x32xf32>
      %44 = vector.shape_cast %41 : vector<8x32xf32> to vector<1x8x32xf32>
      tpu.vector_store %arg7[%c0_24, %c0_25, %c0_26], %44 {strides = array<i32>} : memref<1x8x32xf32, #tpu.memory_space<vmem>>, vector<1x8x32xf32>,
    } else {
    }
    return
  }
  func.func @transform_0(%arg0: i32, %arg1: i32) -> (i32, i32, i32) {
    %c0_i32 = arith.constant 0 : i32
    %c0_i32_0 = arith.constant 0 : i32
    %c0_i32_1 = arith.constant 0 : i32
    return %arg0, %c0_i32, %c0_i32_0 : i32, i32, i32
  }
  func.func @transform_1(%arg0: i32, %arg1: i32) -> (i32, i32, i32) {
    %c0_i32 = arith.constant 0 : i32
    %c0_i32_0 = arith.constant 0 : i32
    %c0_i32_1 = arith.constant 0 : i32
    return %arg0, %c0_i32, %c0_i32_0 : i32, i32, i32
  }
  func.func @transform_2(%arg0: i32, %arg1: i32) -> (i32, i32, i32) {
    %c0_i32 = arith.constant 0 : i32
    %c0_i32_0 = arith.constant 0 : i32
    %c0_i32_1 = arith.constant 0 : i32
    return %arg1, %c0_i32, %c0_i32_0 : i32, i32, i32
  }
  func.func @transform_3(%arg0: i32, %arg1: i32) -> (i32, i32, i32) {
    %c0_i32 = arith.constant 0 : i32
    %c0_i32_0 = arith.constant 0 : i32
    %c0_i32_1 = arith.constant 0 : i32
    return %arg1, %c0_i32, %c0_i32_0 : i32, i32, i32
  }
  func.func @transform_4(%arg0: i32, %arg1: i32) -> (i32, i32) {
    %c0_i32 = arith.constant 0 : i32
    %c0_i32_0 = arith.constant 0 : i32
    %c0_i32_1 = arith.constant 0 : i32
    return %c0_i32, %c0_i32_0 : i32, i32
  }
  func.func @transform_5(%arg0: i32, %arg1: i32) -> (i32, i32, i32) {
    %c0_i32 = arith.constant 0 : i32
    %c0_i32_0 = arith.constant 0 : i32
    %c0_i32_1 = arith.constant 0 : i32
    return %arg0, %c0_i32, %c0_i32_0 : i32, i32, i32
  }
}

</mosaic_0001>

<bundles_post_ra>
// kernel: tpu_custom_call.1
= control target key start
LH: loop header
LB: loop body
LE: loop exit
PB: predicated region body
PF: predicated region fallthrough
CT: control target
= control target key end

     0   :  { %10 = vsyncpa [#allocation4], 0  ;;  %s1101_s0 = inlined_call_operand.vmem [shape: bf16[2,8,32], index: 0, kind: input, shape index: {}]   ;;  %s1102_s1 = inlined_call_operand.vmem [shape: f32[2,1,8], index: 1, kind: input, shape index: {}]   ;;  %s1103_s2 = inlined_call_operand.vmem [shape: bf16[4,32,24], index: 2, kind: input, shape index: {}]   ;;  %s1104_s3 = inlined_call_operand.vmem [shape: bf16[4,8,32], index: 3, kind: input, shape index: {}]   ;;  %s1105_s4 = inlined_call_operand.vmem [shape: f32[1,32], index: 4, kind: input, shape index: {}]   ;;  %s1106_s5 = inlined_call_operand.hbm [shape: f32[2,8,32], index: 5, kind: output, shape index: {}]  }
   0x1   :  { %12 = vsyncpa [#allocation4 + $0x1], 0  ;;  %s923_s18 = smov 0   ;;  %s925_s19 = smov 0  }
   0x2   :  { %s927_s20 = smov 0   ;;  %s929_s21 = smov 0  }
   0x3   :  { %s931_s22 = smov 0   ;;  %s933_s23 = smov 0  }
   0x4   :  { %s935_s24 = smov 0   ;;  %s937_s25 = smov 0  }
   0x5 LB: > { %1113 = sst [smem:[#allocation6_spill]] %s866_s20  ;;  %s651_s26 = sadd.s32 4294967295, %s886_s25   ;;  %s886_s25 = sphi %s937_s25, %s18_s25   ;;  %s882_s24 = sphi %s935_s24, %s1129_s24   ;;  %s878_s23 = sphi %s933_s23, %s1128_s23   ;;  %s874_s22 = sphi %s931_s22, %s1127_s22   ;;  %s870_s21 = sphi %s929_s21, %s1126_s21   ;;  %s866_s20 = sphi %s927_s20, %s1125_s20   ;;  %s862_s19 = sphi %s925_s19, %s1131_s19   ;;  %s858_s18 = sphi %s923_s18, %s1130_s18  }
   0x6   : > { %1114 = sst [smem:[#allocation7_spill]] %s878_s23  ;;  %s652_s27 = sadd.s32 4294967294, %s886_s25  }
   0x7   : > { %1115 = sst [smem:[#allocation8_spill]] %s882_s24  ;;  %s27_s28 = sadd.s32 1, %s878_s23 }
   0x8   : > { %p28_p0 = scmp.ge.s32.totalorder %s27_s28, 4  ;;  %s30_s29 = sadd.s32 1, %s882_s24 }
   0x9   : > { %p172_p1 = scmp.ne.s32.totalorder %s866_s20, %s862_s19  ;;  %p173_p2 = scmp.eq.s32.totalorder %s651_s26, 7 }
   0xa   : > { %s1133_s28 = smov (%p28_p0, %s27_s28), 0  ;;  %s1135_s29 = smov (!%p28_p0, %s30_s29), %s882_s24 }
   0xb   : > { %1116 = sst [smem:[#allocation9_spill]] %s1133_s28  ;;  %p972_p3 = por %p173_p2, %p172_p1 }
   0xc   : > { %p178_p4 = scmp.ne.s32.totalorder %s862_s19, %s858_s18  ;;  %p32_p5 = scmp.ge.s32.totalorder %s1135_s29, 2 }
   0xd   : > { %p179_p6 = scmp.eq.s32.totalorder %s652_s27, 7  ;;  %p655_p7 = scmp.ge.s32.totalorder %s886_s25, 1 }
   0xe   : > { %p228_p8 = scmp.lt.s32.totalorder %s886_s25, 9  ;;  %s1137_s29 = smov (%p32_p5, %s1135_s29), 0 }
   0xf   : > { %1118 = sst [smem:[#allocation10_spill]] %s1137_s29  ;;  %p982_p9 = por %p179_p6, %p178_p4 }
  0x10   : > { %p229_p10 = pnand %p655_p7, %p228_p8  ;;  %s159_s7 = ssub.s32 %s882_s24, %s1137_s29 }
  0x11   : > { %s1119_s6 = scalar_select %p982_p9, 1, 0 }
  0x12   : > { %s162_s8 = sadd.s32 1, %s866_s20  ;;  %p160_p11 = scmp.eq.s32.totalorder %s159_s7, 0 }
  0x13   : > { %1120 = sst [smem:[#allocation11_spill]] %s1119_s6  ;;  %232 = sbr.rel (%p229_p10) target bundleno = 1376 (0x560), region = 40 }
  0x14   : > { %s990_s9 = scalar_select %p160_p11, %s866_s20, %s162_s8  }
  0x15   : > { %s1108_s10 = sand.u32 (!%p229_p10), 1, %s862_s19   ;;  %p267_p12 = scmp.lt.s32.totalorder (!%p229_p10), %s874_s22, 1 }
  0x16   : > { %1121 = sst [smem:[#allocation12_spill]] %s990_s9  ;;  %s996_s11 = sshll.u32 (!%p229_p10), %s1108_s10, 3 }
  0x17   : > { %p274_p13 = scmp.lt.s32.totalorder (!%p229_p10), %s870_s21, 3  ;;  %s266_s6 = scalar_lea.vmem (!%p229_p10), [#allocation3], %s996_s11 }
  0x18   : > { %p661_p0 = scmp.ne.s32.totalorder (!%p229_p10), %s870_s21, 0 }
  0x1a   : > { %s1000_s12 = scalar_select %p267_p12, %s874_s22, 1 }
  0x1b   : > { %s275_s13 = scalar_select %p274_p13, %s870_s21, 3 }
  0x1c   : > { %s657_s14 = sshll.u32 %s1000_s12, 2  ;;  %s273_s17 = scalar_lea.vmem %s1102_s1, %s1000_s12  ;;  %v662_v0 = vld [vmem:[%s1105_s4] ss:$0 sm:$0xff] (!%p661_p0)  ;;  %vm295_vm0 = vcmask (!%p661_p0), 261120  }
  0x1d   : > { %s270_s7 = scalar_lea.vmem %s1101_s0, %s657_s14  ;;  %s675_s8 = sshll.u32 %s275_s13, 4  ;;  %296 = vst.msk [vmem:[#allocation2] sm:$0xff] (!%p661_p0), %vm295_vm0, %v662_v0 }
  0x1e   : > { %s278_s28 = scalar_lea.vmem %s1103_s2, %s675_s8  ;;  %s660_s24 = sshll.u32 %s275_s13, 2 }
  0x1f   : > { %s1017_s20 = scalar_lea.vmem %s1104_s3, %s660_s24  ;;  %287 = sbr.rel (%p661_p0) target bundleno = 38 (0x26), region = 44 }
  0x26 PF: > { %v786_v1 = vld [vmem:[%s278_s28] sm:$0xff]   ;;  %v888_v2 = vmov 0.0   ;;  %v787_v3 = vld [vmem:[%s278_s28 + $0x8] sm:$0xff]   ;;  %vm889_vm1 = vmmov 0   ;;  %vm314_vm2 = vcmask 261120   ;;  %s890_s23 = smov 120  }
  0x27   : > { %685 = vmatprep.subr.bf16.mxu0 %v888_v2  ;;  %693 = vmatprep.subr.bf16.mxu1 %v888_v2  ;;  %v297_v4 = vld [vmem:[%s270_s7] sm:$0xf]  ;;  %vm369_vm3 = vcmask 64512   ;;  %s891_s29 = smov 112   ;;  %vm433_vm4 = vcmask 1043456   ;;  %p670_p1 = scmp.ne.s32.totalorder %s870_s21, 3 }
  0x28   : > { %686 = vmatpush3.bf16.msra.mxu0 %v786_v1  ;;  %689 = vmatprep.mubr.msk.bf16.mxu0 %vm889_vm1, %v888_v2  ;;  %v666_v12 = vld [vmem:[%s273_s17] ss:$0 sm:$0xff] }
  0x29   : > { %687 = vmatprep.subr.bf16.mxu0 %v888_v2  ;;  %695 = vmatprep.mubr.msk.bf16.mxu1 %vm889_vm1, %v888_v2  ;;  %v479_v24 = vld [vmem:[%s1017_s20] sm:$0xf] }
  0x2a   : > { %v484_v25 = vsel %vm433_vm4, %v479_v24, 0  ;;  %v477_v37 = vld [vmem:[#allocation2] sm:$0xff] }
  0x2c   : > { %688 = vmatpush3.bf16.msra.mxu0 %v787_v3 }
  0x2d   : > { %699 = vmatprep.subr.bf16.mxu0 %v888_v2 }
  0x2f   : > { %690 = vmatmul.mubr.msk.bf16.vlgmr.msra.gmra.mrb[0].mxu0 %vm314_vm2, %v297_v4 }
  0x30   : > { %701 = vmatprep.mubr.msk.bf16.mxu0 %vm889_vm1, %v888_v2 }
 0x102   : > { %v352_v5 = vpop.f32.mrb[0].mxu0 }
 0x103   : > { %v358_v6 = vpack.c.bf16 %v352_v5, %v352_v5  ;;  %v691_v7 = vpop.f32.mrb[1].mxu0 }
 0x104   : > { %v355_v8 = vpop.f32.mrb[2].mxu0 }
 0x105   : > { %367 = vrot.lane.b32.xlu0 %v358_v6, %s890_s23  ;;  %v692_v9 = vpop.f32.mrb[3].mxu0 }
 0x177   : > { %v368_v10 = vpop.permute.xlu0 %367 }
 0x178   : > { %v374_v11 = vsel %vm369_vm3, %v368_v10, 0 }
 0x179   : > { %694 = vmatpush3.bf16.xpose.msra.mxu1 %v374_v11 }
 0x17a   : > { %705 = vmatprep.subr.bf16.mxu1 %v888_v2 }
 0x180   : > { %696 = vmatmul.mubr.msk.bf16.vlgmr.msra.gmra.mrb[0].mxu1 %vm369_vm3, %v358_v6 }
 0x181   : > { %707 = vmatprep.mubr.msk.bf16.mxu1 %vm889_vm1, %v888_v2  ;;  %706 = vmatpush3.bf16.msra.mxu1 %v484_v25 }
 0x253   : > { %v410_v13 = vpop.f32.mrb[0].mxu1 }
 0x254   : > { %v411_v14 = vadd.f32 %v666_v12, %v410_v13  ;;  %v697_v15 = vpop.f32.mrb[1].mxu1 }
 0x255   : > { %v413_v16 = vpop.f32.mrb[2].mxu1 }
 0x256   : > { %v698_v17 = vpop.f32.mrb[3].mxu1  ;;  %v416_v18 = vsel %vm369_vm3, %v411_v14, -inf }
 0x257   : > { %417 = vmax.xlane.f32.xlu0 %v416_v18 }
 0x2e4   : > { %v418_v19 = vpop.xlane.xlu0 %417 }
 0x2e5   : > { %v419_v20 = vsub.f32 %v411_v14, %v418_v19 }
 0x2e7   : > { %v420_v21 = vmul.f32 1.442695, %v419_v20 }
 0x2e9   : > { %788 = vpow2.f32 %v420_v21 }
 0x2f3   : > { %v789_v22 = vpop.eup %788 }
 0x2f4   : > { %v422_v23 = vsel %vm369_vm3, %v789_v22, 0.0 }
 0x2f5   : > { %423 = vadd.xlane.f32.xlu1 %v422_v23 }
 0x306   : > { %428 = vrot.lane.b32.xlu1 %v358_v6, %s891_s29 }
 0x382   : > { %v424_v26 = vpop.xlane.xlu1 %423 }
 0x383   : > { %790 = vrcp.f32 %v424_v26 }
 0x386   : > { %v429_v27 = vpop.permute.xlu1 %428 }
 0x387   : > { %v435_v28 = vsel %vm433_vm4, %v429_v27, 0 }
 0x388   : > { %700 = vmatpush3.bf16.msra.mxu0 %v435_v28 }
 0x38d   : > { %v791_v29 = vpop.eup %790 }
 0x38e   : > { %v426_v30 = vmul.f32 %v791_v29, %v789_v22 }
 0x390   : > { %v427_v31 = vpack.c.bf16 %v426_v30, %v426_v30 }
 0x392   : > { %702 = vmatmul.mubr.msk.bf16.vlgmr.msra.gmra.mrb[4].mxu0 %vm369_vm3, %v427_v31 }
 0x465   : > { %v471_v32 = vpop.f32.mrb[4].mxu0 }
 0x466   : > { %v478_v33 = vpack.c.bf16 %v471_v32, %v471_v32  ;;  %v703_v34 = vpop.f32.mrb[5].mxu0 }
 0x467   : > { %v474_v35 = vpop.f32.mrb[6].mxu0 }
 0x468   : > { %v704_v36 = vpop.f32.mrb[7].mxu0  ;;  %708 = vmatmul.mubr.msk.bf16.vlgmr.msra.gmra.mrb[4].mxu1 %vm369_vm3, %v478_v33 }
 0x538   : > { %531 = sbr.rel (%p670_p1) target bundleno = 1351 (0x547), region = 48 }
 0x53b   : > { %v520_v38 = vpop.f32.mrb[4].mxu1 }
 0x53c   : > { %v526_v39 = vadd.f32 %v520_v38, %v477_v37  ;;  %v709_v40 = vpop.f32.mrb[5].mxu1 }
 0x53d   : > { %v523_v41 = vpop.f32.mrb[6].mxu1 }
 0x53e   : > { %527 = vst.msk [vmem:[#allocation2] sm:$0xff] %vm314_vm2, %v526_v39  ;;  %v710_v42 = vpop.f32.mrb[7].mxu1 }
 0x545   : > { %v532_v43 = vld [vmem:[#allocation2] sm:$0xff] }
 0x546   : > { %533 = vst.msk [vmem:[%s266_s6] sm:$0xff] %vm314_vm2, %v532_v43 }
 0x547 PF: > { %s672_s20 = sshll.u32 %s874_s22, 7  ;;  %s548_s13 = sshll.u32 %s266_s6, 4  ;;  %s549_s13 = int_to_ptr.vmem [resolvable:$true] %s548_s13 }
 0x548   : > { %s1050_s12 = scalar_lea.hbm %s1106_s5, %s672_s20  ;;  %s1122_s21 = sand.u32 1, %s862_s19  }
 0x549   : > { %s535_s14 = scalar_lea.sflag [#allocation4], %s1122_s21  ;;  %s792_s17 = scalar_lea.vmem %s549_s13, 128 }
 0x54a   : > { %p793_p2 = scmp.ne.s32.totalorder %s549_s13, %s792_s17  ;;  %s892_s26 = smov [#allocation3]  }
 0x54b   : > { %s796_s27 = sshll.u32 %s892_s26, 4  ;;  %s797_s27 = int_to_ptr.vmem [resolvable:$false] %s796_s27 }
 0x54c   : > { %p794_p4 = pnand %p793_p2, %p972_p3  ;;  %s798_s7 = scalar_lea.vmem %s797_s27, 256 }
 0x54d   : > { %p799_p6 = scmp.lt.s32.totalorder %s549_s13, %s797_s27  ;;  %p800_p7 = scmp.lt.s32.totalorder %s798_s7, %s792_s17 }
 0x54e   : > { %p795_p5 = pneg %p794_p4 }
 0x54f   : > { %p801_p8 = por %p800_p7, %p799_p6 }
 0x551   : > { %p802_p10 = pnand %p801_p8, %p795_p5 }
 0x553   : > { %805 = shalt.err (!%p802_p10)
}
 0x554   : > { %s806_s22 = scalar_lea.hbm %s1050_s12, 128  ;;  %s810_s8 = scalar_lea.hbm %s1106_s5, 256 }
 0x555   : > { %p807_p11 = scmp.ne.s32.totalorder %s1050_s12, %s806_s22  ;;  %p811_p0 = scmp.lt.u32.totalorder %s1050_s12, %s1106_s5 }
 0x556   : > { %p812_p1 = scmp.lt.u32.totalorder %s810_s8, %s806_s22  ;;  %p814_p4 = scmp.lt.u32.totalorder %s806_s22, %s1050_s12 }
 0x557   : > { %p808_p12 = pnand %p807_p11, %p972_p3 }
 0x558   : > { %p813_p2 = por %p812_p1, %p811_p0 }
 0x559   : > { %p809_p13 = pneg %p808_p12 }
 0x55a   : > { %p815_p5 = por %p814_p4, %p813_p2 }
 0x55c   : > { %p816_p6 = pnand %p815_p5, %p809_p13 }
 0x55e   : > { %819 = shalt.err (!%p816_p6)
}
 0x55f   : > { %711 = dma.vmem_to_hbm [thread:$0]  (%p972_p3), %s549_s13, 128, %s1050_s12, %s535_s14  }
 0x560 PF: > { %p717_p7 = scmp.ge.s32.totalorder %s886_s25, 2  ;;  %s560_s24 = sand.u32 1, %s858_s18  }
 0x561   : > { %s561_s28 = scalar_lea.sflag [#allocation4], %s560_s24 }
 0x562   : > { %p714_p8 = pnand %p717_p7, %p982_p9 }
 0x564   : > { %853 = dma.done.wait (!%p714_p8), %s561_s28, 128  }
 0x565   : > { %855 = vsyncadd (!%p714_p8), %s561_s28, 4294967168  ;;  %s18_s25 = sadd.s32 1, %s886_s25   ;;  %s1124_s29 = sld [smem:[#allocation6_spill]] }
 0x566   : > { %p15_p10 = scmp.ge.s32.totalorder %s18_s25, 10   ;;  %s1125_s20 = sld [smem:[#allocation12_spill]] }
 0x567   : > { %s1126_s21 = sld [smem:[#allocation7_spill]]  ;;  %s1127_s22 = sld [smem:[#allocation8_spill]] }
 0x568   : > { %s1128_s23 = sld [smem:[#allocation9_spill]]  ;;  %s1129_s24 = sld [smem:[#allocation10_spill]] }
 0x569   : > { %s1130_s18 = smov %s862_s19  ;;  %17 = sbr.rel (!%p15_p10) target bundleno = 5 (0x5), region = 92 }
 0x56b   : > { %s1131_s19 = smov %s1124_s29 }
 0x570   :  { %566 = vsyncpa [#allocation4], 1 }
 0x571   :  { %568 = vsyncpa [#allocation4 + $0x1], 1 }

</bundles_post_ra>
